<compile_context>
chip_gen: v5e
topology: v5e:2x2
jax: 0.10.0
libtpu: 0.0.40
codegen_flags: <defaults>
</compile_context>

<pallas_src>
import jax
import jax.numpy as jnp
from jax.experimental import pallas as pl
from jax.experimental.pallas import tpu as pltpu

# ----------------------------- synthetic config ------------------------------
BATCH = 2
SEQ = 8
HIDDEN = 128
WORD_VOCAB = 50
TYPE_VOCAB = 2
DETECT_VOCAB = 2            # config.detect_vocab_size
CORRECT_VOCAB = 37          # config.correct_vocab_size (len of correct_tags file)
CLASS_PAD = 128             # fused projection padded to one full lane tile
DET_OFF = 0                                   # detect logits columns [0, 2)
COR_OFF = DETECT_VOCAB                        # correct logits columns [2, 39)
REW_OFF = DETECT_VOCAB + CORRECT_VOCAB        # reward logit column 39
N_REAL = REW_OFF + 1                          # 40 real columns
IGNORE_INDEX = -100
SMOOTHING = 0.1
TILE_CANDIDATES = (1024, 512, 256, 128, 64, 32, 16)   # multiples of 16 (bf16)


def _round_up(x, m):
    return (x + m - 1) // m * m


def _choose_tile(n):
    """Pick (tn, n_pad): tn a multiple of 16, padding at most 15 rows."""
    n_pad = _round_up(n, 16)
    for tn in TILE_CANDIDATES:
        if n_pad % tn == 0:
            return tn, n_pad
    return 16, n_pad   # unreachable (n_pad is a multiple of 16)


# -------------------- fused projection + loss Pallas kernel ------------------
def _fused_kernel(h_ref, w_ref, b_ref, lab_ref, logits_ref, part_ref):
    # Single fused matmul: bf16 operands, f32 accumulation, f32 bias add.
    logits = (jnp.dot(h_ref[...], w_ref[...],
                      preferred_element_type=jnp.float32) + b_ref[...])
    # HBM writeback as bf16 (loss math below stays on the f32 value).
    logits_ref[...] = logits.astype(jnp.bfloat16)

    tn, cpad = logits.shape
    col = jax.lax.broadcasted_iota(jnp.int32, (tn, cpad), 1)
    real_col = col < N_REAL
    det_col = col < DET_OFF + DETECT_VOCAB
    cor_col = jnp.logical_and(col >= COR_OFF, col < COR_OFF + CORRECT_VOCAB)

    # One row-max over the real columns and one exp pass, shared by both losses.
    masked = jnp.where(real_col, logits, -1e30)
    m = jnp.max(masked, axis=-1, keepdims=True)
    e = jnp.exp(masked - m)                                   # padded cols -> 0

    det_den = jnp.maximum(
        jnp.sum(jnp.where(det_col, e, 0.0), axis=-1, keepdims=True), 1e-30)
    cor_den = jnp.maximum(
        jnp.sum(jnp.where(cor_col, e, 0.0), axis=-1, keepdims=True), 1e-30)
    det_lse = m + jnp.log(det_den)
    cor_lse = m + jnp.log(cor_den)

    dl = lab_ref[:, 0:1]                                      # (tn, 1) int32
    cl = lab_ref[:, 1:2]

    det_tgt = jnp.logical_and(col == dl + DET_OFF, det_col)
    cor_tgt = jnp.logical_and(col == cl + COR_OFF, cor_col)
    det_logit_t = jnp.sum(jnp.where(det_tgt, logits, 0.0), -1, keepdims=True)
    cor_logit_t = jnp.sum(jnp.where(cor_tgt, logits, 0.0), -1, keepdims=True)
    cor_sum_logits = jnp.sum(jnp.where(cor_col, logits, 0.0), -1, keepdims=True)

    det_logp_t = det_logit_t - det_lse
    cor_logp_t = cor_logit_t - cor_lse
    # sum over window of logp_j = sum(logits_j) - C * lse
    cor_sum_logp = cor_sum_logits - CORRECT_VOCAB * cor_lse

    det_valid = (dl != IGNORE_INDEX).astype(jnp.float32)      # (tn, 1)
    cor_valid = (cl != IGNORE_INDEX).astype(jnp.float32)

    conf = 1.0 - SMOOTHING
    eps = SMOOTHING / (CORRECT_VOCAB - 1)
    det_per = -det_logp_t                                                   # CE
    cor_per = -(conf * cor_logp_t + eps * (cor_sum_logp - cor_logp_t))      # LS

    d_sum = jnp.sum(det_valid * det_per)
    d_cnt = jnp.sum(det_valid)
    c_sum = jnp.sum(cor_valid * cor_per)
    c_cnt = jnp.sum(cor_valid)

    # Per-tile partials: row 0, lanes 0..3 of an (8,128) f32 tile.  Distinct
    # output block per grid step -> no cross-step state -> grid axis can be
    # "parallel" (megacore on v7x).
    r = jax.lax.broadcasted_iota(jnp.int32, (8, 128), 0)
    c2 = jax.lax.broadcasted_iota(jnp.int32, (8, 128), 1)
    row0 = r == 0
    part = jnp.where(jnp.logical_and(row0, c2 == 0), d_sum,
           jnp.where(jnp.logical_and(row0, c2 == 1), d_cnt,
           jnp.where(jnp.logical_and(row0, c2 == 2), c_sum,
           jnp.where(jnp.logical_and(row0, c2 == 3), c_cnt, 0.0))))
    part_ref[...] = part


def fused_forward(h_bf16, w_all_bf16, b_all, labels, tn):
    n_pad, h = h_bf16.shape
    cpad = w_all_bf16.shape[1]
    num_tiles = n_pad // tn
    logits, partials = pl.pallas_call(
        _fused_kernel,
        out_shape=(jax.ShapeDtypeStruct((n_pad, cpad), jnp.bfloat16),
                   jax.ShapeDtypeStruct((num_tiles * 8, 128), jnp.float32)),
        grid_spec=pltpu.PrefetchScalarGridSpec(
            num_scalar_prefetch=0,
            grid=(num_tiles,),
            in_specs=[pl.BlockSpec((tn, h), lambda i: (i, 0)),
                      pl.BlockSpec((h, cpad), lambda i: (0, 0)),
                      pl.BlockSpec((1, cpad), lambda i: (0, 0)),
                      pl.BlockSpec((tn, 2), lambda i: (i, 0))],
            out_specs=[pl.BlockSpec((tn, cpad), lambda i: (i, 0)),
                       pl.BlockSpec((8, 128), lambda i: (i, 0))]),
        compiler_params=pltpu.CompilerParams(
            dimension_semantics=("parallel",)),
    )(h_bf16, w_all_bf16, b_all, labels)

    sums = jnp.sum(partials.reshape(num_tiles, 8, 128)[:, 0, :4], axis=0)
    detect_loss = sums[0] / jnp.maximum(sums[1], 1.0)
    correct_loss = sums[2] / jnp.maximum(sums[3], 1.0)
    return logits, detect_loss, correct_loss


# --------------------------- synthetic "BERT" glue ----------------------------
def synthetic_bert(params, input_ids, attention_mask, token_type_ids):
    # TODO(synk): replaces the pretrained BertModel encoder stack; the
    # attention_mask is unused because no self-attention is computed here.
    del attention_mask
    we = params["word_emb"][input_ids]                      # (B, S, H)
    pe = params["pos_emb"][jnp.arange(input_ids.shape[1])][None]
    te = params["type_emb"][token_type_ids]
    x = we + pe + te
    mu = jnp.mean(x, axis=-1, keepdims=True)
    var = jnp.mean((x - mu) ** 2, axis=-1, keepdims=True)
    x = (x - mu) / jnp.sqrt(var + 1e-12)
    return x * params["ln_gamma"] + params["ln_beta"]       # (B, S, H)


# ----------------------------- parameter init ---------------------------------
def init_params(key):
    ks = jax.random.split(key, 10)
    p = {
        "word_emb": 0.02 * jax.random.normal(ks[0], (WORD_VOCAB, HIDDEN), jnp.float32),
        "pos_emb": 0.02 * jax.random.normal(ks[1], (SEQ, HIDDEN), jnp.float32),
        "type_emb": 0.02 * jax.random.normal(ks[2], (TYPE_VOCAB, HIDDEN), jnp.float32),
        "ln_gamma": jnp.ones((HIDDEN,), jnp.float32),
        "ln_beta": jnp.zeros((HIDDEN,), jnp.float32),
        # raw (unfused, f32) projection weights -- kept for the reference check
        "wd": 0.02 * jax.random.normal(ks[3], (HIDDEN, DETECT_VOCAB), jnp.float32),
        "bd": 0.02 * jax.random.normal(ks[4], (DETECT_VOCAB,), jnp.float32),
        "wc": 0.02 * jax.random.normal(ks[5], (HIDDEN, CORRECT_VOCAB), jnp.float32),
        "bc": 0.02 * jax.random.normal(ks[6], (CORRECT_VOCAB,), jnp.float32),
        "wr": 0.02 * jax.random.normal(ks[7], (HIDDEN, 1), jnp.float32),
        "br": 0.02 * jax.random.normal(ks[8], (1,), jnp.float32),
    }
    # fused (H, 128) weight slab: [detect | correct | reward | zero pad]
    w_all = jnp.zeros((HIDDEN, CLASS_PAD), jnp.float32)
    w_all = w_all.at[:, DET_OFF:DET_OFF + DETECT_VOCAB].set(p["wd"])
    w_all = w_all.at[:, COR_OFF:COR_OFF + CORRECT_VOCAB].set(p["wc"])
    w_all = w_all.at[:, REW_OFF:REW_OFF + 1].set(p["wr"])
    b_all = jnp.zeros((1, CLASS_PAD), jnp.float32)
    b_all = b_all.at[0, DET_OFF:DET_OFF + DETECT_VOCAB].set(p["bd"])
    b_all = b_all.at[0, COR_OFF:COR_OFF + CORRECT_VOCAB].set(p["bc"])
    b_all = b_all.at[0, REW_OFF:REW_OFF + 1].set(p["br"])
    p["w_all_bf16"] = w_all.astype(jnp.bfloat16)
    p["b_all"] = b_all
    return p


# ------------------------------ module forward --------------------------------
def modeling_ctc_bert_forward(params, input_ids, attention_mask, token_type_ids,
                              detect_labels=None, correct_labels=None):
    hidden = synthetic_bert(params, input_ids, attention_mask, token_type_ids)
    b, s, h = hidden.shape
    n = b * s

    # dropout(hidden_dropout_prob) is identity in eval mode.
    tn, n_pad = _choose_tile(n)

    # Cast where produced; pad (<= 15 rows) only when n is not a multiple of 16.
    h_flat = hidden.reshape(n, h).astype(jnp.bfloat16)
    if n_pad != n:
        h_flat = jnp.concatenate(
            [h_flat, jnp.zeros((n_pad - n, h), jnp.bfloat16)], axis=0)

    # Merge detect/correct labels into one (n_pad, 2) int32 slab.
    def to_col(lab):
        if lab is None:
            return jnp.full((n,), IGNORE_INDEX, jnp.int32)
        return lab.reshape(n).astype(jnp.int32)

    labels = jnp.stack([to_col(detect_labels), to_col(correct_labels)], axis=-1)
    if n_pad != n:
        labels = jnp.concatenate(
            [labels, jnp.full((n_pad - n, 2), IGNORE_INDEX, jnp.int32)], axis=0)

    logits_pad, detect_loss, correct_loss = fused_forward(
        h_flat, params["w_all_bf16"], params["b_all"], labels, tn)

    # Slice the padded bf16 logits once; everything else is a view of it.
    logits_real = logits_pad[:n, :N_REAL].astype(jnp.float32).reshape(b, s, N_REAL)
    detect_outputs = logits_real[..., DET_OFF:DET_OFF + DETECT_VOCAB]
    correct_outputs = logits_real[..., COR_OFF:COR_OFF + CORRECT_VOCAB]
    # reward_estimate_projection(hidden_states[:, 0, :]) -> (B, 1)
    reward_outputs = logits_real[:, 0, REW_OFF:REW_OFF + 1]

    result = {"detect_outputs": detect_outputs,
              "correct_outputs": correct_outputs,
              "reward_outputs": reward_outputs,
              "detect_loss": None, "correct_loss": None, "loss": None}

    loss = None
    if detect_labels is not None and correct_labels is not None:
        loss = detect_loss + correct_loss
        result["detect_loss"] = detect_loss
        result["correct_loss"] = correct_loss
    elif detect_labels is not None:
        loss = detect_loss
    elif correct_labels is not None:
        loss = correct_loss
    result["loss"] = loss
    return result


# --------------------------- pure-JAX reference --------------------------------
def _ref_loss(logits, labels, smoothing):
    c = logits.shape[-1]
    logp = jax.nn.log_softmax(logits, axis=-1)
    valid = labels != IGNORE_INDEX
    safe = jnp.where(valid, labels, 0)
    logp_t = jnp.take_along_axis(logp, safe[:, None], axis=-1)[:, 0]
    if smoothing > 0.0:
        conf = 1.0 - smoothing
        eps = smoothing / (c - 1)
        per = -(conf * logp_t + eps * (jnp.sum(logp, -1) - logp_t))
    else:
        per = -logp_t
    cnt = jnp.maximum(jnp.sum(valid), 1)
    return jnp.sum(jnp.where(valid, per, 0.0)) / cnt


def reference_forward(params, input_ids, attention_mask, token_type_ids,
                      detect_labels, correct_labels):
    hidden = synthetic_bert(params, input_ids, attention_mask, token_type_ids)
    det = hidden @ params["wd"] + params["bd"]
    cor = hidden @ params["wc"] + params["bc"]
    rew = hidden[:, 0, :] @ params["wr"] + params["br"]
    dloss = _ref_loss(det.reshape(-1, DETECT_VOCAB),
                      detect_labels.reshape(-1), 0.0)
    closs = _ref_loss(cor.reshape(-1, CORRECT_VOCAB),
                      correct_labels.reshape(-1), SMOOTHING)
    return det, cor, rew, dloss, closs


# ------------------------------------ main ------------------------------------
if __name__ == "__main__":
    key = jax.random.PRNGKey(0)
    pkey, ikey, dkey, ckey = jax.random.split(key, 4)

    params = init_params(pkey)

    input_ids = jax.random.randint(ikey, (BATCH, SEQ), 1, 10, dtype=jnp.int32)
    attention_mask = jnp.ones((BATCH, SEQ), jnp.int32)
    token_type_ids = jnp.zeros((BATCH, SEQ), jnp.int32)
    detect_labels = jax.random.randint(dkey, (BATCH, SEQ), 0, DETECT_VOCAB,
                                       dtype=jnp.int32)
    correct_labels = jax.random.randint(ckey, (BATCH, SEQ), 0, CORRECT_VOCAB,
                                        dtype=jnp.int32)
    # exercise ignore_index handling
    detect_labels = detect_labels.at[:, -1].set(IGNORE_INDEX)
    correct_labels = correct_labels.at[0, 0].set(IGNORE_INDEX)

    result = modeling_ctc_bert_forward(params, input_ids, attention_mask,
                                       token_type_ids, detect_labels,
                                       correct_labels)
    jax.block_until_ready(result)

    assert result["detect_outputs"].shape == (BATCH, SEQ, DETECT_VOCAB)
    assert result["correct_outputs"].shape == (BATCH, SEQ, CORRECT_VOCAB)
    assert result["reward_outputs"].shape == (BATCH, 1)
    assert bool(jnp.isfinite(result["detect_loss"]))
    assert bool(jnp.isfinite(result["correct_loss"]))
    assert bool(jnp.isfinite(result["loss"]))

    # numerical check vs pure-JAX f32 reference (bf16 matmul + bf16 logit
    # writeback => loose tolerance)
    ref_det, ref_cor, ref_rew, ref_dl, ref_cl = reference_forward(
        params, input_ids, attention_mask, token_type_ids,
        detect_labels, correct_labels)
    assert jnp.allclose(result["detect_outputs"], ref_det, atol=5e-2, rtol=5e-2)
    assert jnp.allclose(result["correct_outputs"], ref_cor, atol=5e-2, rtol=5e-2)
    assert jnp.allclose(result["reward_outputs"], ref_rew, atol=5e-2, rtol=5e-2)
    assert jnp.allclose(result["detect_loss"], ref_dl, atol=5e-2, rtol=5e-2)
    assert jnp.allclose(result["correct_loss"], ref_cl, atol=5e-2, rtol=5e-2)

    print("KERNEL_OK")
</pallas_src>

<mosaic_0001>
module attributes {stable_mosaic.version = 11 : i64} {
  func.func @_fused_kernel(%arg0: i32, %arg1: memref<16x128xbf16, #tpu.memory_space<vmem>>, %arg2: memref<128x128xbf16, #tpu.memory_space<vmem>>, %arg3: memref<1x128xf32, #tpu.memory_space<vmem>>, %arg4: memref<16x2xi32, #tpu.memory_space<vmem>>, %arg5: memref<16x128xbf16, #tpu.memory_space<vmem>>, %arg6: memref<8x128xf32, #tpu.memory_space<vmem>>) attributes {dimension_semantics = [#tpu.dimension_semantics<parallel>], iteration_bounds = array<i64: 1>, scalar_prefetch = 0 : i64, scratch_operands = 0 : i64, tpu.core_type = #tpu.core_type<tc>, window_params = [{transform_indices = @transform_0, window_bounds = array<i64: 16, 128>}, {pipeline_mode = #tpu.pipeline_mode<synchronous>, transform_indices = @transform_1, window_bounds = array<i64: 128, 128>}, {pipeline_mode = #tpu.pipeline_mode<synchronous>, transform_indices = @transform_2, window_bounds = array<i64: 1, 128>}, {transform_indices = @transform_3, window_bounds = array<i64: 16, 2>}, {transform_indices = @transform_4, window_bounds = array<i64: 16, 128>}, {transform_indices = @transform_5, window_bounds = array<i64: 8, 128>}]} {
    %c0 = arith.constant 0 : index
    %c0_0 = arith.constant 0 : index
    %0 = vector.load %arg1[%c0, %c0_0] : memref<16x128xbf16, #tpu.memory_space<vmem>>, vector<16x128xbf16>
    %c0_1 = arith.constant 0 : index
    %c0_2 = arith.constant 0 : index
    %1 = vector.load %arg2[%c0_1, %c0_2] : memref<128x128xbf16, #tpu.memory_space<vmem>>, vector<128x128xbf16>
    %cst = arith.constant dense<0.000000e+00> : vector<16x128xf32>
    %2 = tpu.matmul %0, %1, %cst {dimension_numbers = #tpu.dot_dimension_numbers<[1], [0], [0], [1], [0, 0, 1, 1], [], []>} : vector<16x128xbf16>, vector<128x128xbf16>, vector<16x128xf32> -> vector<16x128xf32>
    %c0_3 = arith.constant 0 : index
    %c0_4 = arith.constant 0 : index
    %3 = vector.load %arg3[%c0_3, %c0_4] : memref<1x128xf32, #tpu.memory_space<vmem>>, vector<1x128xf32>
    %4 = vector.broadcast %3 : vector<1x128xf32> to vector<16x128xf32>
    %5 = arith.addf %2, %4 : vector<16x128xf32>
    %6 = arith.truncf %5 : vector<16x128xf32> to vector<16x128xbf16>
    %c0_5 = arith.constant 0 : index
    %c0_6 = arith.constant 0 : index
    %7 = vector.load %arg5[%c0_5, %c0_6] : memref<16x128xbf16, #tpu.memory_space<vmem>>, vector<16x128xbf16>
    tpu.vector_store %arg5[%c0_5, %c0_6], %6 {strides = array<i32>} : memref<16x128xbf16, #tpu.memory_space<vmem>>, vector<16x128xbf16>,
    %8 = tpu.iota {dimensions = array<i32: 1>} : vector<16x128xi32>
    %c40_i32 = arith.constant 40 : i32
    %9 = vector.broadcast %c40_i32 : i32 to vector<16x128xi32>
    %10 = arith.cmpi slt, %8, %9 : vector<16x128xi32>
    %c2_i32 = arith.constant 2 : i32
    %11 = vector.broadcast %c2_i32 : i32 to vector<16x128xi32>
    %12 = arith.cmpi slt, %8, %11 : vector<16x128xi32>
    %c2_i32_7 = arith.constant 2 : i32
    %13 = vector.broadcast %c2_i32_7 : i32 to vector<16x128xi32>
    %14 = arith.cmpi sge, %8, %13 : vector<16x128xi32>
    %c39_i32 = arith.constant 39 : i32
    %15 = vector.broadcast %c39_i32 : i32 to vector<16x128xi32>
    %16 = arith.cmpi slt, %8, %15 : vector<16x128xi32>
    %17 = arith.andi %14, %16 : vector<16x128xi1>
    %cst_8 = arith.constant -1.000000e+30 : f32
    %18 = vector.broadcast %cst_8 : f32 to vector<16x128xf32>
    %19 = arith.select %10, %5, %18 : vector<16x128xi1>, vector<16x128xf32>
    %cst_9 = arith.constant dense<0xFF800000> : vector<16xf32>
    %20 = vector.multi_reduction <maximumf>, %19, %cst_9 [1] : vector<16x128xf32> to vector<16xf32>
    %21 = vector.shape_cast %20 : vector<16xf32> to vector<16x1xf32>
    %22 = vector.broadcast %21 : vector<16x1xf32> to vector<16x128xf32>
    %23 = arith.subf %19, %22 : vector<16x128xf32>
    %24 = math.exp %23 : vector<16x128xf32>
    %cst_10 = arith.constant 0.000000e+00 : f32
    %25 = vector.broadcast %cst_10 : f32 to vector<16x128xf32>
    %26 = arith.select %12, %24, %25 : vector<16x128xi1>, vector<16x128xf32>
    %cst_11 = arith.constant dense<0.000000e+00> : vector<16xf32>
    %27 = vector.multi_reduction <add>, %26, %cst_11 [1] : vector<16x128xf32> to vector<16xf32>
    %28 = vector.shape_cast %27 : vector<16xf32> to vector<16x1xf32>
    %cst_12 = arith.constant 1.000000e-30 : f32
    %29 = vector.broadcast %cst_12 : f32 to vector<16x1xf32>
    %30 = arith.maximumf %28, %29 : vector<16x1xf32>
    %cst_13 = arith.constant 0.000000e+00 : f32
    %31 = vector.broadcast %cst_13 : f32 to vector<16x128xf32>
    %32 = arith.select %17, %24, %31 : vector<16x128xi1>, vector<16x128xf32>
    %cst_14 = arith.constant dense<0.000000e+00> : vector<16xf32>
    %33 = vector.multi_reduction <add>, %32, %cst_14 [1] : vector<16x128xf32> to vector<16xf32>
    %34 = vector.shape_cast %33 : vector<16xf32> to vector<16x1xf32>
    %cst_15 = arith.constant 1.000000e-30 : f32
    %35 = vector.broadcast %cst_15 : f32 to vector<16x1xf32>
    %36 = arith.maximumf %34, %35 : vector<16x1xf32>
    %37 = math.log %30 : vector<16x1xf32>
    %38 = arith.addf %21, %37 : vector<16x1xf32>
    %39 = math.log %36 : vector<16x1xf32>
    %40 = arith.addf %21, %39 : vector<16x1xf32>
    %c0_16 = arith.constant 0 : index
    %c0_17 = arith.constant 0 : index
    %41 = vector.load %arg4[%c0_16, %c0_17] : memref<16x2xi32, #tpu.memory_space<vmem>>, vector<16x1xi32>
    %c0_18 = arith.constant 0 : index
    %c1 = arith.constant 1 : index
    %42 = vector.load %arg4[%c0_18, %c1] : memref<16x2xi32, #tpu.memory_space<vmem>>, vector<16x1xi32>
    %c0_i32 = arith.constant 0 : i32
    %43 = vector.broadcast %c0_i32 : i32 to vector<16x1xi32>
    %44 = arith.addi %41, %43 : vector<16x1xi32>
    %45 = vector.broadcast %44 : vector<16x1xi32> to vector<16x128xi32>
    %46 = arith.cmpi eq, %8, %45 : vector<16x128xi32>
    %47 = arith.andi %46, %12 : vector<16x128xi1>
    %c2_i32_19 = arith.constant 2 : i32
    %48 = vector.broadcast %c2_i32_19 : i32 to vector<16x1xi32>
    %49 = arith.addi %42, %48 : vector<16x1xi32>
    %50 = vector.broadcast %49 : vector<16x1xi32> to vector<16x128xi32>
    %51 = arith.cmpi eq, %8, %50 : vector<16x128xi32>
    %52 = arith.andi %51, %17 : vector<16x128xi1>
    %cst_20 = arith.constant 0.000000e+00 : f32
    %53 = vector.broadcast %cst_20 : f32 to vector<16x128xf32>
    %54 = arith.select %47, %5, %53 : vector<16x128xi1>, vector<16x128xf32>
    %cst_21 = arith.constant dense<0.000000e+00> : vector<16xf32>
    %55 = vector.multi_reduction <add>, %54, %cst_21 [1] : vector<16x128xf32> to vector<16xf32>
    %56 = vector.shape_cast %55 : vector<16xf32> to vector<16x1xf32>
    %cst_22 = arith.constant 0.000000e+00 : f32
    %57 = vector.broadcast %cst_22 : f32 to vector<16x128xf32>
    %58 = arith.select %52, %5, %57 : vector<16x128xi1>, vector<16x128xf32>
    %cst_23 = arith.constant dense<0.000000e+00> : vector<16xf32>
    %59 = vector.multi_reduction <add>, %58, %cst_23 [1] : vector<16x128xf32> to vector<16xf32>
    %60 = vector.shape_cast %59 : vector<16xf32> to vector<16x1xf32>
    %cst_24 = arith.constant 0.000000e+00 : f32
    %61 = vector.broadcast %cst_24 : f32 to vector<16x128xf32>
    %62 = arith.select %17, %5, %61 : vector<16x128xi1>, vector<16x128xf32>
    %cst_25 = arith.constant dense<0.000000e+00> : vector<16xf32>
    %63 = vector.multi_reduction <add>, %62, %cst_25 [1] : vector<16x128xf32> to vector<16xf32>
    %64 = vector.shape_cast %63 : vector<16xf32> to vector<16x1xf32>
    %65 = arith.subf %56, %38 : vector<16x1xf32>
    %66 = arith.subf %60, %40 : vector<16x1xf32>
    %cst_26 = arith.constant 3.700000e+01 : f32
    %67 = vector.broadcast %cst_26 : f32 to vector<16x1xf32>
    %68 = arith.mulf %67, %40 : vector<16x1xf32>
    %69 = arith.subf %64, %68 : vector<16x1xf32>
    %c-100_i32 = arith.constant -100 : i32
    %70 = vector.broadcast %c-100_i32 : i32 to vector<16x1xi32>
    %71 = arith.cmpi ne, %41, %70 : vector<16x1xi32>
    %72 = arith.extui %71 : vector<16x1xi1> to vector<16x1xi32>
    %73 = arith.sitofp %72 : vector<16x1xi32> to vector<16x1xf32>
    %c-100_i32_27 = arith.constant -100 : i32
    %74 = vector.broadcast %c-100_i32_27 : i32 to vector<16x1xi32>
    %75 = arith.cmpi ne, %42, %74 : vector<16x1xi32>
    %76 = arith.extui %75 : vector<16x1xi1> to vector<16x1xi32>
    %77 = arith.sitofp %76 : vector<16x1xi32> to vector<16x1xf32>
    %cst_28 = arith.constant 0.000000e+00 : f32
    %78 = vector.broadcast %cst_28 : f32 to vector<16x1xf32>
    %79 = arith.subf %78, %65 : vector<16x1xf32>
    %cst_29 = arith.constant 0.899999976 : f32
    %80 = vector.broadcast %cst_29 : f32 to vector<16x1xf32>
    %81 = arith.mulf %80, %66 : vector<16x1xf32>
    %82 = arith.subf %69, %66 : vector<16x1xf32>
    %cst_30 = arith.constant 0.00277777785 : f32
    %83 = vector.broadcast %cst_30 : f32 to vector<16x1xf32>
    %84 = arith.mulf %83, %82 : vector<16x1xf32>
    %85 = arith.addf %81, %84 : vector<16x1xf32>
    %cst_31 = arith.constant 0.000000e+00 : f32
    %86 = vector.broadcast %cst_31 : f32 to vector<16x1xf32>
    %87 = arith.subf %86, %85 : vector<16x1xf32>
    %88 = arith.mulf %73, %79 : vector<16x1xf32>
    %89 = vector.shape_cast %88 : vector<16x1xf32> to vector<1x16x1xf32>
    %cst_32 = arith.constant dense<0.000000e+00> : vector<1xf32>
    %90 = vector.multi_reduction <add>, %89, %cst_32 [1, 2] : vector<1x16x1xf32> to vector<1xf32>
    %91 = vector.shape_cast %90 : vector<1xf32> to vector<1x1x1xf32>
    %92 = vector.extract %91[0, 0, 0] : f32 from vector<1x1x1xf32>
    %93 = vector.shape_cast %73 : vector<16x1xf32> to vector<1x16x1xf32>
    %cst_33 = arith.constant dense<0.000000e+00> : vector<1xf32>
    %94 = vector.multi_reduction <add>, %93, %cst_33 [1, 2] : vector<1x16x1xf32> to vector<1xf32>
    %95 = vector.shape_cast %94 : vector<1xf32> to vector<1x1x1xf32>
    %96 = vector.extract %95[0, 0, 0] : f32 from vector<1x1x1xf32>
    %97 = arith.mulf %77, %87 : vector<16x1xf32>
    %98 = vector.shape_cast %97 : vector<16x1xf32> to vector<1x16x1xf32>
    %cst_34 = arith.constant dense<0.000000e+00> : vector<1xf32>
    %99 = vector.multi_reduction <add>, %98, %cst_34 [1, 2] : vector<1x16x1xf32> to vector<1xf32>
    %100 = vector.shape_cast %99 : vector<1xf32> to vector<1x1x1xf32>
    %101 = vector.extract %100[0, 0, 0] : f32 from vector<1x1x1xf32>
    %102 = vector.shape_cast %77 : vector<16x1xf32> to vector<1x16x1xf32>
    %cst_35 = arith.constant dense<0.000000e+00> : vector<1xf32>
    %103 = vector.multi_reduction <add>, %102, %cst_35 [1, 2] : vector<1x16x1xf32> to vector<1xf32>
    %104 = vector.shape_cast %103 : vector<1xf32> to vector<1x1x1xf32>
    %105 = vector.extract %104[0, 0, 0] : f32 from vector<1x1x1xf32>
    %106 = tpu.iota {dimensions = array<i32: 0>} : vector<8x128xi32>
    %107 = tpu.iota {dimensions = array<i32: 1>} : vector<8x128xi32>
    %c0_i32_36 = arith.constant 0 : i32
    %108 = vector.broadcast %c0_i32_36 : i32 to vector<8x128xi32>
    %109 = arith.cmpi eq, %106, %108 : vector<8x128xi32>
    %c0_i32_37 = arith.constant 0 : i32
    %110 = vector.broadcast %c0_i32_37 : i32 to vector<8x128xi32>
    %111 = arith.cmpi eq, %107, %110 : vector<8x128xi32>
    %112 = arith.andi %109, %111 : vector<8x128xi1>
    %c1_i32 = arith.constant 1 : i32
    %113 = vector.broadcast %c1_i32 : i32 to vector<8x128xi32>
    %114 = arith.cmpi eq, %107, %113 : vector<8x128xi32>
    %115 = arith.andi %109, %114 : vector<8x128xi1>
    %c2_i32_38 = arith.constant 2 : i32
    %116 = vector.broadcast %c2_i32_38 : i32 to vector<8x128xi32>
    %117 = arith.cmpi eq, %107, %116 : vector<8x128xi32>
    %118 = arith.andi %109, %117 : vector<8x128xi1>
    %c3_i32 = arith.constant 3 : i32
    %119 = vector.broadcast %c3_i32 : i32 to vector<8x128xi32>
    %120 = arith.cmpi eq, %107, %119 : vector<8x128xi32>
    %121 = arith.andi %109, %120 : vector<8x128xi1>
    %cst_39 = arith.constant 0.000000e+00 : f32
    %122 = vector.broadcast %105 : f32 to vector<8x128xf32>
    %123 = vector.broadcast %cst_39 : f32 to vector<8x128xf32>
    %124 = arith.select %121, %122, %123 : vector<8x128xi1>, vector<8x128xf32>
    %125 = vector.broadcast %101 : f32 to vector<8x128xf32>
    %126 = arith.select %118, %125, %124 : vector<8x128xi1>, vector<8x128xf32>
    %127 = vector.broadcast %96 : f32 to vector<8x128xf32>
    %128 = arith.select %115, %127, %126 : vector<8x128xi1>, vector<8x128xf32>
    %129 = vector.broadcast %92 : f32 to vector<8x128xf32>
    %130 = arith.select %112, %129, %128 : vector<8x128xi1>, vector<8x128xf32>
    %c0_40 = arith.constant 0 : index
    %c0_41 = arith.constant 0 : index
    %131 = vector.load %arg6[%c0_40, %c0_41] : memref<8x128xf32, #tpu.memory_space<vmem>>, vector<8x128xf32>
    tpu.vector_store %arg6[%c0_40, %c0_41], %130 {strides = array<i32>} : memref<8x128xf32, #tpu.memory_space<vmem>>, vector<8x128xf32>,
    return
  }
  func.func @transform_0(%arg0: i32) -> (i32, i32) {
    %c0_i32 = arith.constant 0 : i32
    %c0_i32_0 = arith.constant 0 : i32
    return %arg0, %c0_i32 : i32, i32
  }
  func.func @transform_1(%arg0: i32) -> (i32, i32) {
    %c0_i32 = arith.constant 0 : i32
    %c0_i32_0 = arith.constant 0 : i32
    %c0_i32_1 = arith.constant 0 : i32
    return %c0_i32, %c0_i32_0 : i32, i32
  }
  func.func @transform_2(%arg0: i32) -> (i32, i32) {
    %c0_i32 = arith.constant 0 : i32
    %c0_i32_0 = arith.constant 0 : i32
    %c0_i32_1 = arith.constant 0 : i32
    return %c0_i32, %c0_i32_0 : i32, i32
  }
  func.func @transform_3(%arg0: i32) -> (i32, i32) {
    %c0_i32 = arith.constant 0 : i32
    %c0_i32_0 = arith.constant 0 : i32
    return %arg0, %c0_i32 : i32, i32
  }
  func.func @transform_4(%arg0: i32) -> (i32, i32) {
    %c0_i32 = arith.constant 0 : i32
    %c0_i32_0 = arith.constant 0 : i32
    return %arg0, %c0_i32 : i32, i32
  }
  func.func @transform_5(%arg0: i32) -> (i32, i32) {
    %c0_i32 = arith.constant 0 : i32
    %c0_i32_0 = arith.constant 0 : i32
    return %arg0, %c0_i32 : i32, i32
  }
}

</mosaic_0001>

<bundles_post_ra>
// kernel: tpu_custom_call.1
= control target key start
LH: loop header
LB: loop body
LE: loop exit
PB: predicated region body
PF: predicated region fallthrough
CT: control target
= control target key end

     0   :  { %11 = vsyncpa [#allocation3], 0  ;;  %s684_s0 = inlined_call_operand.vmem [shape: bf16[16,128], index: 0, kind: input, shape index: {}]   ;;  %s685_s1 = inlined_call_operand.hbm [shape: bf16[128,128], index: 1, kind: input, shape index: {}]   ;;  %s686_s2 = inlined_call_operand.vmem [shape: f32[1,128], index: 2, kind: input, shape index: {}]   ;;  %s687_s3 = inlined_call_operand.vmem [shape: s32[16,2], index: 3, kind: input, shape index: {}]   ;;  %s688_s4 = inlined_call_operand.hbm [shape: bf16[16,128], index: 4, kind: output, shape index: {0}]   ;;  %s689_s5 = inlined_call_operand.hbm [shape: f32[8,128], index: 5, kind: output, shape index: {1}]  }
   0x1   :  { %12 = vsyncpa [#allocation4], 0 }
   0x2   :  { %13 = vsyncpa [#allocation7], 0  ;;  %s20_s20 = sshll.u32 %s685_s1, 4  ;;  %s539_s21 = smov [#allocation2]   ;;  %s21_s20 = int_to_ptr.hbm [resolvable:$true] %s20_s20 }
   0x3   :  { %s22_s22 = sshll.u32 %s539_s21, 4  ;;  %s540_s23 = smov 64   ;;  %s23_s22 = int_to_ptr.vmem [resolvable:$true] %s22_s22 }
   0x4   :  { %s541_s24 = smov 4  }
   0x5   :  { %28 = dma.hbm_to_vmem [thread:$0]  %s21_s20, 1024, %s23_s22, [#allocation3], %s540_s23, %s540_s23, %s541_s24  }
   0x6   :  { %533 = dma.done.wait [#allocation3], 1024  }
   0x7   :  { %534 = vsyncadd [#allocation3], 4294966272  ;;  %v416_v0 = vld [vmem:[#allocation2 + $0x38] sm:$0xff]  ;;  %v415_v1 = vld [vmem:[#allocation2 + $0x30] sm:$0xff]  ;;  %v542_v2 = vmov 1   ;;  %v131_v14 = vlaneseq  ;;  %v543_v18 = vmov 0  }
   0x8   :  { %113 = vmatpush.bf16.msra.mxu0 %v416_v0  ;;  %439 = vset.pattern.permute.xlu1 %v542_v2  ;;  %v587_v3 = vld [vmem:[%s687_s3] sm:$0xff]  ;;  %v414_v5 = vld [vmem:[#allocation2 + $0x28] sm:$0xff]  ;;  %v412_v9 = vld [vmem:[#allocation2 + $0x18] sm:$0xff]  ;;  %vm248_vm15 = vcmask 7168   ;;  %s341_s7 = sshll.u32 %s688_s4, 4  ;;  %s546_s8 = smov [#allocation5]   ;;  %s342_s7 = int_to_ptr.hbm [resolvable:$true] %s341_s7 }
   0x9   :  { %v190_v4 = vadd.s32 2, %v587_v3  ;;  %v593_v6 = vld [vmem:[%s687_s3 + $0x8] sm:$0xff]  ;;  %v413_v7 = vld [vmem:[#allocation2 + $0x20] sm:$0xff]  ;;  %v411_v10 = vld [vmem:[#allocation2 + $0x10] sm:$0xff]  ;;  %v600_v16 = vand.u32 127, %v131_v14  ;;  %441 = vset.pattern.permute.xlu0 %v543_v18  ;;  %440 = vset.pattern.permute.xlu2 %v543_v18  ;;  %vm228_vm14 = vcmp.ne.s32.totalorder %v587_v3, 4294967196 }
   0xa   :  { %v191_v8 = vadd.s32 2, %v593_v6  ;;  %v410_v11 = vld [vmem:[#allocation2 + $0x8] sm:$0xff]  ;;  %v409_v12 = vld [vmem:[#allocation2] sm:$0xff]  ;;  %vm229_vm13 = vcmp.ne.s32.totalorder %v593_v6, 4294967196  ;;  %s339_s9 = sshll.u32 %s546_s8, 4  ;;  %s547_s13 = smov [#allocation6]   ;;  %s340_s9 = int_to_ptr.vmem [resolvable:$true] %s339_s9 }
   0xb   :  { %193 = vperm.xlu1 %439, %v190_v4   ;;  %v408_v13 = vld [vmem:[%s684_s0] sm:$0xff]  ;;  %vm135_vm0 = vcmp.ge.s32.totalorder %v600_v16, 2  ;;  %vm136_vm1 = vcmp.lt.s32.totalorder %v600_v16, 39  ;;  %vm133_vm3 = vcmp.lt.s32.totalorder %v600_v16, 40  ;;  %vm134_vm9 = vcmp.lt.s32.totalorder %v600_v16, 2  ;;  %s545_s0 = smov 127  }
   0xc   :  { %114 = vmatpush.bf16.msra.mxu0 %v415_v1  ;;  %v448_v17 = vld [vmem:[%s686_s2] ss:$0 sm:$0xff]  ;;  %vm607_vm2 = vmand %vm135_vm0, %vm136_vm1  ;;  %vm324_vm1 = vcmp.eq.s32.totalorder %v600_v16, 3  ;;  %s353_s14 = sshll.u32 %s547_s13, 4  ;;  %s355_s17 = sshll.u32 %s689_s5, 4  ;;  %s354_s14 = int_to_ptr.vmem [resolvable:$true] %s353_s14  ;;  %s356_s17 = int_to_ptr.hbm [resolvable:$true] %s355_s17 }
  0x10   :  { %115 = vmatpush.bf16.msra.mxu0 %v414_v5 }
  0x13   :  { %196 = vperm.xlu1 %439, %v191_v8  }
  0x14   :  { %116 = vmatpush.bf16.msra.mxu0 %v413_v7 }
  0x18   :  { %117 = vmatpush.bf16.msra.mxu0 %v412_v9  ;;  %v544_v9 = vmov 0.0  }
  0x1c   :  { %118 = vmatpush.bf16.msra.mxu0 %v411_v10  ;;  %v407_v10 = vsel %vm229_vm13, 1.0, %v544_v9 }
  0x20   :  { %119 = vmatpush.bf16.msra.mxu0 %v410_v11 }
  0x24   :  { %120 = vmatpush.bf16.msra.mxu0 %v409_v12 }
  0x27   :  { %121 = vmatmul.bf16.vlgmr.msra.gmra.mxu0 %v408_v13 }
  0x7d   :  { %v194_v15 = vpop.permute.xlu1 %193 }
  0x7e   :  { %vm198_vm6 = vcmp.eq.s32.totalorder %v600_v16, %v194_v15 }
  0x7f   :  { %vm200_vm7 = vmand %vm198_vm6, %vm607_vm2 }
  0x85   :  { %v197_v22 = vpop.permute.xlu1 %196 }
  0x86   :  { %vm199_vm4 = vcmp.eq.s32.totalorder %v600_v16, %v197_v22 }
  0x87   :  { %vm201_vm5 = vmand %vm199_vm4, %vm607_vm2 }
  0xa4   :  { %v122_v19 = vpop.f32.mrf.mxu0 }
  0xa5   :  { %v612_v21 = vadd.f32 %v448_v17, %v122_v19 }
  0xa7   :  { %v214_v23 = vsel %vm607_vm2, %v612_v21, 0.0  ;;  %v138_v24 = vsel %vm133_vm3, %v612_v21, -1e+30  ;;  %v208_v30 = vsel %vm200_vm7, %v612_v21, 0.0 }
  0xa8   :  { %216 = vadd.xlane.f32.xlu2 %v214_v23  ;;  %140 = vmax.xlane.f32.xlu0 %v138_v24 }
  0xac   :  { %v124_v25 = vpop.f32.mrf.mxu0 }
  0xad   :  { %v125_v26 = vadd.f32 %v448_v17, %v124_v25 }
  0xaf   :  { %v209_v27 = vsel %vm201_vm5, %v125_v26, 0.0  ;;  %v139_v28 = vsel %vm133_vm3, %v125_v26, -1e+30  ;;  %v420_v29 = vpack.c.bf16 %v125_v26, %v612_v21  ;;  %v215_v31 = vsel %vm607_vm2, %v125_v26, 0.0 }
  0xb0   :  { %212 = vadd.xlane.f32.xlu1 %v209_v27  ;;  %142 = vmax.xlane.f32.xlu0 %v139_v28  ;;  %v262_v27 = vsel %vm248_vm15, %v407_v10, 0.0  ;;  %vm320_vm3 = vcmp.eq.s32.totalorder %v600_v16, 1  ;;  %vm318_vm5 = vcmp.eq.s32.totalorder %v600_v16, 0 }
  0xb1   :  { %421 = vst [vmem:[#allocation5] sm:$0xff] %v420_v29  }
  0xb2   :  { %347 = dma.vmem_to_hbm [thread:$0]  %s340_s9, 128, %s342_s7, [#allocation4], %s540_s23, %s540_s23, %s541_s24  }
  0xb8   :  { %210 = vadd.xlane.f32.xlu0 %v208_v30 }
  0xc0   :  { %218 = vadd.xlane.f32.xlu0 %v215_v31 }
  0xd4   :  { %184 = vperm.xlu0 %441, %v593_v6   ;;  %v406_v6 = vsel %vm228_vm14, 1.0, %v544_v9 }
  0xd5   :  { %v442_v22 = vpack.i.bf16 %v407_v10, %v406_v6 }
  0xdc   :  { %447 = vset.pattern.permute.xlu0 %v542_v2 }
 0x11b   :  { %v629_v32 = vpop.xlane.xlu0 %140  ;;  %v217_v47 = vpop.xlane.xlu2 %216 }
 0x11c   :  { %v144_v33 = vsub.f32 %v138_v24, %v629_v32 }
 0x11e   :  { %v146_v34 = vmul.f32 1.442695, %v144_v33 }
 0x120   :  { %449 = vpow2.f32 %v146_v34 }
 0x123   :  { %v632_v35 = vpop.xlane.xlu0 %142  ;;  %v213_v60 = vpop.xlane.xlu1 %212 }
 0x124   :  { %v145_v36 = vsub.f32 %v139_v28, %v632_v35 }
 0x126   :  { %v450_v37 = vpop.eup %449  ;;  %v148_v38 = vmul.f32 1.442695, %v145_v36 }
 0x127   :  { %v158_v39 = vsel %vm607_vm2, %v450_v37, 0.0  ;;  %v150_v46 = vsel %vm134_vm9, %v450_v37, 0.0 }
 0x128   :  { %451 = vpow2.f32 %v148_v38  ;;  %160 = vadd.xlane.f32.xlu2 %v158_v39 }
 0x12b   :  { %v211_v42 = vpop.xlane.xlu0 %210 }
 0x12e   :  { %v452_v40 = vpop.eup %451 }
 0x12f   :  { %v159_v41 = vsel %vm607_vm2, %v452_v40, 0.0  ;;  %v151_v2 = vsel %vm134_vm9, %v452_v40, 0.0  ;;  %vm322_vm2 = vcmp.eq.s32.totalorder %v600_v16, 2 }
 0x130   :  { %162 = vadd.xlane.f32.xlu2 %v159_v41 }
 0x133   :  { %v219_v43 = vpop.xlane.xlu0 %218 }
 0x146   :  { %v185_v44 = vpop.permute.xlu0 %184 }
 0x147   :  { %vm187_vm8 = vcmp.eq.s32.totalorder %v600_v16, %v185_v44 }
 0x148   :  { %181 = vperm.xlu2 %440, %v587_v3   ;;  %vm189_vm10 = vmand %vm187_vm8, %vm134_vm9 }
 0x149   :  { %v203_v45 = vsel %vm189_vm10, %v125_v26, 0.0  ;;  %v261_v26 = vsel %vm248_vm15, %v406_v6, 0.0 }
 0x14a   :  { %206 = vadd.xlane.f32.xlu0 %v203_v45  ;;  %v263_v28 = vadd.f32 %v262_v27, %v261_v26 }
 0x171   :  { %152 = vadd.xlane.f32.xlu2 %v150_v46 }
 0x19b   :  { %v161_v48 = vpop.xlane.xlu2 %160 }
 0x19c   :  { %v164_v49 = vmax.f32 %v161_v48, 1e-30 }
 0x19e   :  { %453 = vlog2.f32 %v164_v49 }
 0x1a3   :  { %v163_v50 = vpop.xlane.xlu2 %162 }
 0x1a4   :  { %v165_v51 = vmax.f32 %v163_v50, 1e-30  ;;  %v454_v52 = vpop.eup %453 }
 0x1a5   :  { %v173_v56 = vmul.f32 0.6931472, %v454_v52 }
 0x1a6   :  { %455 = vlog2.f32 %v165_v51 }
 0x1a7   :  { %v176_v61 = vadd.f32 %v173_v56, %v629_v32 }
 0x1a9   :  { %v224_v1 = vmul.f32 37.0, %v176_v61  ;;  %v222_v12 = vsub.f32 %v211_v42, %v176_v61 }
 0x1ab   :  { %v182_v53 = vpop.permute.xlu2 %181  ;;  %v226_v8 = vsub.f32 %v217_v47, %v224_v1  ;;  %v236_v18 = vmul.f32 0.9, %v222_v12 }
 0x1ac   :  { %v456_v54 = vpop.eup %455  ;;  %vm186_vm11 = vcmp.eq.s32.totalorder %v600_v16, %v182_v53 }
 0x1ad   :  { %v175_v55 = vmul.f32 0.6931472, %v456_v54  ;;  %vm188_vm12 = vmand %vm186_vm11, %vm134_vm9  ;;  %v238_v15 = vsub.f32 %v226_v8, %v222_v12 }
 0x1ae   :  { %v202_v57 = vsel %vm188_vm12, %v612_v21, 0.0 }
 0x1af   :  { %v177_v58 = vadd.f32 %v175_v55, %v632_v35  ;;  %204 = vadd.xlane.f32.xlu1 %v202_v57  ;;  %v240_v17 = vmul.f32 0.0027777778, %v238_v15 }
 0x1b1   :  { %v225_v59 = vmul.f32 37.0, %v177_v58  ;;  %v223_v62 = vsub.f32 %v213_v60, %v177_v58  ;;  %v242_v19 = vadd.f32 %v240_v17, %v236_v18 }
 0x1b3   :  { %v227_v63 = vsub.f32 %v219_v43, %v225_v59  ;;  %v237_v4 = vmul.f32 0.9, %v223_v62  ;;  %v244_v20 = vsub.f32 0.0, %v242_v19 }
 0x1b5   :  { %v239_v0 = vsub.f32 %v227_v63, %v223_v62  ;;  %v273_v21 = vmul.f32 %v406_v6, %v244_v20 }
 0x1b7   :  { %154 = vadd.xlane.f32.xlu1 %v151_v2  ;;  %v241_v5 = vmul.f32 0.0027777778, %v239_v0 }
 0x1b9   :  { %v243_v7 = vadd.f32 %v241_v5, %v237_v4 }
 0x1bb   :  { %v245_v11 = vsub.f32 0.0, %v243_v7 }
 0x1bd   :  { %v274_v13 = vmul.f32 %v407_v10, %v245_v11  ;;  %v207_v40 = vpop.xlane.xlu0 %206 }
 0x1bf   :  { %279 = vrot.lane.b32.xlu2 %v274_v13, %s545_s0 }
 0x1d0   :  { %277 = vrot.lane.b32.xlu1 %v273_v21, %s545_s0 }
 0x1d8   :  { %443 = vrot.lane.b32.xlu1 %v442_v22, %s545_s0 }
 0x1e4   :  { %v153_v23 = vpop.xlane.xlu2 %152 }
 0x1e5   :  { %v156_v24 = vmax.f32 %v153_v23, 1e-30 }
 0x1e7   :  { %457 = vlog2.f32 %v156_v24  ;;  %v316_v24 = vshrl.u32 %v131_v14, 7 }
 0x1e8   :  { %264 = vadd.xlane.f32.xlu2 %v263_v28 }
 0x1e9   :  { %vm317_vm0 = vcmp.eq.s32.totalorder %v316_v24, 0 }
 0x1ea   :  { %vm325_vm4 = vmand %vm317_vm0, %vm324_vm1 }
 0x1eb   :  { %vm323_vm6 = vmand %vm317_vm0, %vm322_vm2 }
 0x1ec   :  { %vm321_vm7 = vmand %vm317_vm0, %vm320_vm3 }
 0x1ed   :  { %v458_v29 = vpop.eup %457  ;;  %vm319_vm8 = vmand %vm317_vm0, %vm318_vm5 }
 0x1ee   :  { %v167_v31 = vmul.f32 0.6931472, %v458_v29 }
 0x1f0   :  { %v170_v33 = vadd.f32 %v167_v31, %v629_v32 }
 0x219   :  { %v280_v48 = vpop.permute.xlu2 %279 }
 0x21a   :  { %v284_v32 = vsel %vm248_vm15, %v280_v48, 0.0 }
 0x222   :  { %v205_v25 = vpop.xlane.xlu1 %204 }
 0x223   :  { %v220_v34 = vsub.f32 %v205_v25, %v170_v33 }
 0x225   :  { %v234_v38 = vsub.f32 0.0, %v220_v34 }
 0x227   :  { %v246_v42 = vmul.f32 %v406_v6, %v234_v38 }
 0x229   :  { %v249_v45 = vsel %vm248_vm15, %v246_v42, 0.0 }
 0x22a   :  { %v155_v30 = vpop.xlane.xlu1 %154 }
 0x22b   :  { %v157_v3 = vmax.f32 %v155_v30, 1e-30 }
 0x22d   :  { %459 = vlog2.f32 %v157_v3 }
 0x233   :  { %v460_v36 = vpop.eup %459 }
 0x234   :  { %v169_v37 = vmul.f32 0.6931472, %v460_v36 }
 0x236   :  { %v171_v39 = vadd.f32 %v169_v37, %v632_v35 }
 0x238   :  { %v221_v41 = vsub.f32 %v207_v40, %v171_v39 }
 0x23a   :  { %v235_v43 = vsub.f32 0.0, %v221_v41 }
 0x23c   :  { %v247_v44 = vmul.f32 %v407_v10, %v235_v43 }
 0x23e   :  { %v250_v46 = vsel %vm248_vm15, %v247_v44, 0.0 }
 0x23f   :  { %v251_v47 = vadd.f32 %v250_v46, %v249_v45 }
 0x241   :  { %252 = vadd.xlane.f32.xlu1 %v251_v47 }
 0x242   :  { %v278_v49 = vpop.permute.xlu1 %277 }
 0x243   :  { %v283_v50 = vsel %vm248_vm15, %v278_v49, 0.0 }
 0x244   :  { %v285_v51 = vadd.f32 %v284_v32, %v283_v50 }
 0x246   :  { %286 = vadd.xlane.f32.xlu0 %v285_v51 }
 0x24a   :  { %v444_v35 = vpop.permute.xlu1 %443 }
 0x24b   :  { %v446_v52 = vunpack.i.h.bf16 %v444_v35  ;;  %v445_v53 = vunpack.i.l.bf16 %v444_v35 }
 0x24d   :  { %v303_v54 = vsel %vm248_vm15, %v445_v53, 0.0  ;;  %v304_v55 = vsel %vm248_vm15, %v446_v52, 0.0 }
 0x24e   :  { %v305_v56 = vadd.f32 %v304_v55, %v303_v54 }
 0x250   :  { %306 = vadd.xlane.f32.xlu0 %v305_v56 }
 0x25b   :  { %v265_v57 = vpop.xlane.xlu2 %264 }
 0x25c   :  { %v266_v58 = vrot.slane %v265_v57, 4 }
 0x25e   :  { %v267_v59 = vadd.f32 %v266_v58, %v265_v57 }
 0x260   :  { %v268_v60 = vrot.slane %v267_v59, 2 }
 0x262   :  { %v269_v63 = vadd.f32 %v268_v60, %v267_v59 }
 0x264   :  { %v270_v5 = vrot.slane %v269_v63, 1 }
 0x266   :  { %v271_v11 = vadd.f32 %v270_v5, %v269_v63 }
 0x2b4   :  { %v253_v61 = vpop.xlane.xlu1 %252 }
 0x2b5   :  { %v254_v62 = vrot.slane %v253_v61, 4 }
 0x2b7   :  { %v255_v0 = vadd.f32 %v254_v62, %v253_v61 }
 0x2b9   :  { %v256_v1 = vrot.slane %v255_v0, 2  ;;  %v287_v2 = vpop.xlane.xlu0 %286 }
 0x2ba   :  { %v288_v4 = vrot.slane %v287_v2, 4 }
 0x2bb   :  { %v257_v7 = vadd.f32 %v256_v1, %v255_v0 }
 0x2bc   :  { %v289_v8 = vadd.f32 %v288_v4, %v287_v2 }
 0x2bd   :  { %v258_v9 = vrot.slane %v257_v7, 1 }
 0x2be   :  { %v290_v10 = vrot.slane %v289_v8, 2 }
 0x2bf   :  { %v259_v12 = vadd.f32 %v258_v9, %v257_v7 }
 0x2c0   :  { %v291_v13 = vadd.f32 %v290_v10, %v289_v8 }
 0x2c1   :  { %422 = vpush %v259_v12 }
 0x2c2   :  { %424 = vpush %v271_v11  ;;  %v292_v15 = vrot.slane %v291_v13, 1 }
 0x2c3   :  { %v307_v17 = vpop.xlane.xlu0 %306 }
 0x2c4   :  { %v308_v18 = vrot.slane %v307_v17, 4  ;;  %v293_v19 = vadd.f32 %v292_v15, %v291_v13 }
 0x2c6   :  { %v309_v20 = vadd.f32 %v308_v18, %v307_v17  ;;  %426 = vpush %v293_v19 }
 0x2c8   :  { %v310_v6 = vrot.slane %v309_v20, 2 }
 0x2ca   :  { %v311_v21 = vadd.f32 %v310_v6, %v309_v20 }
 0x2cc   :  { %v312_v22 = vrot.slane %v311_v21, 1 }
 0x2ce   :  { %v313_v23 = vadd.f32 %v312_v22, %v311_v21 }
 0x2d0   :  { %428 = vpush %v313_v23 }
 0x2f2   :  { %s423_s4 = spop %422 }
 0x2f3   :  { %s425_s10 = spop %424  ;;  %v332_v29 = vstv %s423_s4 }
 0x2f4   :  { %v330_v27 = vstv %s425_s10 }
 0x2f7   :  { %s427_s11 = spop %426 }
 0x2f8   :  { %v328_v25 = vstv %s427_s11 }
 0x301   :  { %s429_s12 = spop %428 }
 0x302   :  { %v326_v14 = vstv %s429_s12 }
 0x303   :  { %v327_v26 = vsel %vm325_vm4, %v326_v14, 0.0 }
 0x304   :  { %v329_v28 = vsel %vm323_vm6, %v328_v25, %v327_v26 }
 0x305   :  { %v331_v16 = vsel %vm321_vm7, %v330_v27, %v329_v28 }
 0x306   :  { %v333_v30 = vsel %vm319_vm8, %v332_v29, %v331_v16 }
 0x307   :  { %334 = vst [vmem:[#allocation6] sm:$0xff] %v333_v30 }
 0x308   :  { %358 = dma.vmem_to_hbm [thread:$0]  %s354_s14, 128, %s356_s17, [#allocation7]  }
 0x309   :  { %535 = dma.done.wait [#allocation4], 128  }
 0x30a   :  { %536 = vsyncadd [#allocation4], 4294967168 }
 0x30b   :  { %537 = dma.done.wait [#allocation7], 128  }
 0x30c   :  { %538 = vsyncadd [#allocation7], 4294967168 }
 0x30d   :  { %367 = vsyncpa [#allocation3], 1 }
 0x30e   :  { %368 = vsyncpa [#allocation4], 1 }
 0x30f   :  { %369 = vsyncpa [#allocation7], 1 }

</bundles_post_ra>
